<compile_context>
chip_gen: v5e
topology: v5e:2x2
jax: 0.10.0
libtpu: 0.0.40
codegen_flags: <defaults>
</compile_context>

<pallas_src>
import functools

import jax
import jax.numpy as jnp
from jax import lax
from jax.experimental import pallas as pl
from jax.experimental.pallas import tpu as pltpu

BF16 = jnp.bfloat16
# TODO(synk): per-generation budget; safe on all of v5e/v6e/v7x at these dims.
VMEM_LIMIT_BYTES = 48 * 1024 * 1024


# ----------------------------------------------------------------------------
# In-kernel helpers (f32 math)
# ----------------------------------------------------------------------------
def _layernorm(x, g, b, eps=1e-5):
    mu = jnp.mean(x, axis=-1, keepdims=True)
    var = jnp.mean((x - mu) ** 2, axis=-1, keepdims=True)
    return (x - mu) * lax.rsqrt(var + eps) * g + b


def _gelu(x):
    # exact (erf) GELU, matching torch.nn.GELU() default.
    # TODO(synk): tanh approximation (EUP slot) only if VALU-bound at prod dims.
    return 0.5 * x * (1.0 + lax.erf(x * 0.7071067811865475))


# ----------------------------------------------------------------------------
# Kernel 1: tube-embedding (running max over tkk slabs) + pos-embedding
# ----------------------------------------------------------------------------
def embed_kernel(disp_ref, pts_ref, conv_w_ref, pos_w_ref, pos_b_ref, x0_ref,
                 *, tkk):
    ntok = pts_ref.shape[0]
    dim = conv_w_ref.shape[1]
    cw = conv_w_ref[...]

    def body(j, feat):
        # one (ntok, 4) slab at a time -> live state bounded to (ntok, dim)
        y = jnp.dot(disp_ref[j], cw, preferred_element_type=jnp.float32)
        return jnp.maximum(feat, y)

    feat = lax.fori_loop(0, tkk, body,
                         jnp.full((ntok, dim), -jnp.inf, jnp.float32))
    pos = jnp.dot(pts_ref[...], pos_w_ref[...],
                  preferred_element_type=jnp.float32) + pos_b_ref[...]
    # emb_complex=False branch of the reference model.
    x0_ref[...] = feat + pos


def tube_pos_embed(disp, pts, params, cfg):
    B, tkk, ntok, _ = disp.shape
    dim = cfg['dim']
    kernel = functools.partial(embed_kernel, tkk=tkk)
    return pl.pallas_call(
        kernel,
        out_shape=jax.ShapeDtypeStruct((B, ntok, dim), jnp.float32),
        grid=(B,),
        in_specs=[
            pl.BlockSpec((None, tkk, ntok, 4), lambda b: (b, 0, 0, 0)),
            pl.BlockSpec((None, ntok, 4), lambda b: (b, 0, 0)),
            pl.BlockSpec((4, dim), lambda b: (0, 0)),
            pl.BlockSpec((4, dim), lambda b: (0, 0)),
            pl.BlockSpec((1, dim), lambda b: (0, 0)),
        ],
        out_specs=pl.BlockSpec((None, ntok, dim), lambda b: (b, 0, 0)),
        compiler_params=pltpu.CompilerParams(
            dimension_semantics=("parallel",),
            vmem_limit_bytes=VMEM_LIMIT_BYTES),
    )(disp, pts, params['conv_w'], params['pos_w'], params['pos_b'])


# ----------------------------------------------------------------------------
# Kernel 2: transformer (depth-resident activation) + token max-pool
# ----------------------------------------------------------------------------
def transformer_kernel(x0_ref,
                       ln1g_ref, ln1b_ref, wqkv_ref, wo_ref, bo_ref,
                       ln2g_ref, ln2b_ref, w1_ref, b1_ref, w2_ref, b2_ref,
                       pooled_ref, x_sc,
                       *, bb, ntok, heads, dim_head, scale):
    layer = pl.program_id(1)
    dim = x_sc.shape[-1]
    tt = bb * ntok
    inner = heads * dim_head

    @pl.when(layer == 0)
    def _init():
        x_sc[...] = x0_ref[...].reshape(tt, dim)

    x = x_sc[...]                                              # (tt, dim) f32

    # ---- pre-norm multi-head attention ----
    h1 = _layernorm(x, ln1g_ref[...], ln1b_ref[...])
    # single merged QKV projection: (tt, dim) @ (dim, 3*inner)
    qkv = jnp.dot(h1.astype(BF16), wqkv_ref[...],
                  preferred_element_type=jnp.float32)          # (tt, 3*inner)

    ctx_parts = []
    for h in range(heads):      # static unroll; one head's scores live at a time
        off = h * dim_head
        # softmax scale folded into q (cheaper than scaling dots)
        q_h = (qkv[:, off:off + dim_head] * scale).reshape(bb, ntok, dim_head)
        k_h = qkv[:, inner + off:inner + off + dim_head].reshape(bb, ntok, dim_head)
        v_h = qkv[:, 2 * inner + off:2 * inner + off + dim_head].reshape(bb, ntok, dim_head)
        dots = lax.dot_general(q_h.astype(BF16), k_h.astype(BF16),
                               (((2,), (2,)), ((0,), (0,))),
                               preferred_element_type=jnp.float32)   # (bb,ntok,ntok)
        m = jnp.max(dots, axis=-1, keepdims=True)
        e = jnp.exp(dots - m)
        s = jnp.sum(e, axis=-1, keepdims=True)
        attn = e * pl.reciprocal(s, approx=True)                      # softmax (f32)
        ctx_h = lax.dot_general(attn.astype(BF16), v_h.astype(BF16),
                                (((2,), (1,)), ((0,), (0,))),
                                preferred_element_type=jnp.float32)   # (bb,ntok,dh)
        ctx_parts.append(ctx_h.reshape(tt, dim_head))
    ctx = jnp.concatenate(ctx_parts, axis=-1)                  # (tt, inner)

    # single merged output projection: (tt, inner) @ (inner, dim)
    x = x + jnp.dot(ctx.astype(BF16), wo_ref[...],
                    preferred_element_type=jnp.float32) + bo_ref[...]

    # ---- pre-norm feed-forward ----
    h2 = _layernorm(x, ln2g_ref[...], ln2b_ref[...])
    y1 = _gelu(jnp.dot(h2.astype(BF16), w1_ref[...],
                       preferred_element_type=jnp.float32) + b1_ref[...])
    x = x + jnp.dot(y1.astype(BF16), w2_ref[...],
                    preferred_element_type=jnp.float32) + b2_ref[...]
    x_sc[...] = x

    # NOTE: output block index is constant along the depth axis, so the output
    # block stays VMEM-resident and is written back only after the last step.
    @pl.when(layer == pl.num_programs(1) - 1)
    def _pool():
        pooled_ref[...] = jnp.max(x.reshape(bb, ntok, dim), axis=1, keepdims=True)


_LAYER_KEYS = ('ln1_g', 'ln1_b', 'wqkv', 'wo', 'bo',
               'ln2_g', 'ln2_b', 'w1', 'b1', 'w2', 'b2')


def transformer_pool(x0, params, cfg, bb):
    B, ntok, dim = x0.shape
    depth, heads, dh = cfg['depth'], cfg['heads'], cfg['dim_head']
    weights = [params[k] for k in _LAYER_KEYS]

    def layer_spec(a):          # weights stacked over depth, indexed by d
        nd = a.ndim
        return pl.BlockSpec((None,) + a.shape[1:],
                            lambda b, d, nd=nd: (d,) + (0,) * (nd - 1))

    kernel = functools.partial(transformer_kernel, bb=bb, ntok=ntok,
                               heads=heads, dim_head=dh,
                               scale=float(dh) ** -0.5)
    pooled = pl.pallas_call(
        kernel,
        out_shape=jax.ShapeDtypeStruct((B, 1, dim), jnp.float32),
        grid=(B // bb, depth),
        in_specs=[pl.BlockSpec((bb, ntok, dim), lambda b, d: (b, 0, 0))]
                 + [layer_spec(w) for w in weights],
        out_specs=pl.BlockSpec((bb, 1, dim), lambda b, d: (b, 0, 0)),
        scratch_shapes=[pltpu.VMEM((bb * ntok, dim), jnp.float32)],
        # TODO(synk): pltpu.CORE_PARALLEL on the batch axis for v7x (2 TCs).
        compiler_params=pltpu.CompilerParams(
            dimension_semantics=("parallel", "arbitrary"),
            vmem_limit_bytes=VMEM_LIMIT_BYTES),
    )(x0, *weights)
    return pooled[:, 0, :]


# ----------------------------------------------------------------------------
# Kernel 3: mlp_head (tiny; keeps head weights out of the transformer grid)
# ----------------------------------------------------------------------------
def head_kernel(pooled_ref, g_ref, b_ref, w1_ref, b1_ref, w2_ref, b2_ref, o_ref):
    h = _layernorm(pooled_ref[...], g_ref[...], b_ref[...])
    z = _gelu(jnp.dot(h.astype(BF16), w1_ref[...],
                      preferred_element_type=jnp.float32) + b1_ref[...])
    o_ref[...] = jnp.dot(z.astype(BF16), w2_ref[...],
                         preferred_element_type=jnp.float32) + b2_ref[...]


def mlp_head(pooled, params, cfg):
    B = pooled.shape[0]
    nc = cfg['num_classes']
    nc_pad = params['head_w2'].shape[1]
    out = pl.pallas_call(
        head_kernel,
        out_shape=jax.ShapeDtypeStruct((B, nc_pad), jnp.float32),
    )(pooled, params['head_ln_g'], params['head_ln_b'],
      params['head_w1'], params['head_b1'],
      params['head_w2'], params['head_b2'])
    return out[:, :nc]


# ----------------------------------------------------------------------------
# Plain-JAX glue: FPS, ball query, grouping (data-dependent gathers)
# ----------------------------------------------------------------------------
def gather_points(points, idx):
    # points (B, N, C), idx (B, ...) -> (B, ..., C)
    return jax.vmap(lambda p, i: p[i])(points, idx)


def farthest_point_sample(xyz, npoint):
    B, N, _ = xyz.shape

    def body(i, state):
        idxs, dists, far = state
        idxs = idxs.at[:, i].set(far)
        centroid = gather_points(xyz, far[:, None])        # (B, 1, 3)
        d = jnp.sum((xyz - centroid) ** 2, axis=-1)        # (B, N)
        dists = jnp.minimum(dists, d)
        far = jnp.argmax(dists, axis=-1).astype(jnp.int32)
        return idxs, dists, far

    init = (jnp.zeros((B, npoint), jnp.int32),
            jnp.full((B, N), 1e10, jnp.float32),
            jnp.zeros((B,), jnp.int32))
    idxs, _, _ = jax.lax.fori_loop(0, npoint, body, init)
    return idxs


def ball_query(radius, nsample, xyz, new_xyz):
    # xyz: (B, N, 3) candidates, new_xyz: (B, M, 3) anchors -> (B, M, nsample)
    B, N, _ = xyz.shape
    d2 = jnp.sum((new_xyz[:, :, None, :] - xyz[:, None, :, :]) ** 2, axis=-1)
    mask = d2 < radius * radius
    order = jnp.where(mask, jnp.arange(N, dtype=jnp.int32)[None, None, :],
                      jnp.int32(N))
    idx = jnp.argsort(order, axis=-1)[:, :, :nsample].astype(jnp.int32)
    cnt = jnp.sum(mask, axis=-1, keepdims=True)
    first = jnp.where(cnt > 0, idx[:, :, :1], 0)
    slot_ok = jnp.arange(nsample)[None, None, :] < cnt
    return jnp.where(slot_ok, idx, first)


def p4dconv_prepare(xyzs, cfg):
    # xyzs (B, L, N, 3) -> anchors (B, Lp, M, 3), disp (B, TK*K, Lp*M, 4)
    # disp slabs ordered (tk, k) so the kernel running-max pools over TK*K slabs.
    B, L, N, _ = xyzs.shape
    tk, ts = cfg['temporal_kernel_size'], cfg['temporal_stride']
    pad_front, pad_back = 1, 0                       # temporal_padding=[1, 0]
    assert tk % 2 == 1
    assert (L + pad_front + pad_back - tk) % ts == 0
    frames = ([xyzs[:, 0]] * pad_front
              + [xyzs[:, i] for i in range(L)]
              + [xyzs[:, -1]] * pad_back)            # replicate padding
    tr = tk // 2
    M = N // cfg['spatial_stride']
    K, r = cfg['nsamples'], cfg['radius']

    anchors, disps = [], []
    for t in range(tr, len(frames) - tr, ts):
        a_idx = farthest_point_sample(frames[t], M)          # (B, M)
        a_xyz = gather_points(frames[t], a_idx)              # (B, M, 3)
        win = []
        for i in range(t - tr, t + tr + 1):
            nbr = frames[i]
            idx = ball_query(r, K, nbr, a_xyz)               # (B, M, K)
            grouped = gather_points(nbr, idx)                # (B, M, K, 3)
            xyz_d = grouped - a_xyz[:, :, None, :]
            t_d = jnp.full((B, M, K, 1), float(i - t), dtype=jnp.float32)
            win.append(jnp.concatenate([xyz_d, t_d], axis=-1))   # (B, M, K, 4)
        disps.append(jnp.stack(win, axis=1))                 # (B, TK, M, K, 4)
        anchors.append(a_xyz)

    Lp = len(anchors)
    new_xyz = jnp.stack(anchors, axis=1)                     # (B, Lp, M, 3)
    disp = jnp.stack(disps, axis=1)                          # (B, Lp, TK, M, K, 4)
    disp = disp.transpose(0, 2, 4, 1, 3, 5).reshape(B, tk * K, Lp * M, 4)
    return new_xyz, disp


# ----------------------------------------------------------------------------
# Full model forward + deterministic parameter init
# ----------------------------------------------------------------------------
def p4transformer_forward(x, params, cfg):
    B = x.shape[0]
    new_xyz, disp = p4dconv_prepare(x, cfg)
    Lp, M = new_xyz.shape[1], new_xyz.shape[2]
    t = jnp.arange(Lp, dtype=jnp.float32).reshape(1, Lp, 1, 1)
    t = jnp.broadcast_to(t, (B, Lp, M, 1))
    pts = jnp.concatenate([new_xyz, t], axis=-1).reshape(B, Lp * M, 4)

    x0 = tube_pos_embed(disp, pts, params, cfg)              # (B, ntok, dim)

    bb = min(cfg.get('batch_tile', 2), B)                    # batch tile Bb
    while B % bb:
        bb -= 1
    pooled = transformer_pool(x0, params, cfg, bb)           # (B, dim)
    return mlp_head(pooled, params, cfg)                     # (B, num_classes)


def init_params(key, cfg):
    keys = iter(jax.random.split(key, 16))

    def nrm(shape, s=0.02, dtype=BF16):
        return (jax.random.normal(next(keys), shape, jnp.float32) * s).astype(dtype)

    dim, mlp, nc = cfg['dim'], cfg['mlp_dim'], cfg['num_classes']
    heads, dh, depth = cfg['heads'], cfg['dim_head'], cfg['depth']
    inner = heads * dh
    nc_pad = ((nc + 127) // 128) * 128               # lane-dense head output

    p = {
        # P4DConv conv_d (bias=False) and pos_embedding Conv1d(4, dim, k=1): f32
        'conv_w': nrm((4, dim), dtype=jnp.float32),
        'pos_w': nrm((4, dim), dtype=jnp.float32),
        'pos_b': jnp.zeros((1, dim), jnp.float32),
        # transformer layers, stacked over depth; QKV merged [Q|K|V] lane-major
        'ln1_g': jnp.ones((depth, 1, dim), jnp.float32),
        'ln1_b': jnp.zeros((depth, 1, dim), jnp.float32),
        'wqkv': nrm((depth, dim, 3 * inner)),
        'wo': nrm((depth, inner, dim)),
        'bo': jnp.zeros((depth, 1, dim), jnp.float32),
        'ln2_g': jnp.ones((depth, 1, dim), jnp.float32),
        'ln2_b': jnp.zeros((depth, 1, dim), jnp.float32),
        'w1': nrm((depth, dim, mlp)),
        'b1': jnp.zeros((depth, 1, mlp), jnp.float32),
        'w2': nrm((depth, mlp, dim)),
        'b2': jnp.zeros((depth, 1, dim), jnp.float32),
        # mlp_head (num_classes padded to a multiple of 128)
        'head_ln_g': jnp.ones((1, dim), jnp.float32),
        'head_ln_b': jnp.zeros((1, dim), jnp.float32),
        'head_w1': nrm((dim, mlp)),
        'head_b1': jnp.zeros((1, mlp), jnp.float32),
        'head_w2': jnp.zeros((mlp, nc_pad), BF16).at[:, :nc].set(nrm((mlp, nc))),
        'head_b2': jnp.zeros((1, nc_pad), jnp.float32),
    }
    return p


if __name__ == "__main__":
    cfg = dict(radius=0.5, nsamples=8, spatial_stride=2, temporal_kernel_size=3,
               temporal_stride=2, emb_complex=False, dim=32, depth=2, heads=2,
               dim_head=16, mlp_dim=64, num_classes=10, batch_tile=2)
    key = jax.random.PRNGKey(0)
    kx, kp = jax.random.split(key)
    B, L, N = 2, 4, 32
    x = jax.random.uniform(kx, (B, L, N, 3), dtype=jnp.float32)   # (B, L, N, 3)
    params = init_params(kp, cfg)

    logits = p4transformer_forward(x, params, cfg)
    logits = jax.block_until_ready(logits)
    assert logits.shape == (B, cfg['num_classes'])
    assert bool(jnp.all(jnp.isfinite(logits)))
    print("KERNEL_OK")
</pallas_src>

<mosaic_0001>
module attributes {stable_mosaic.version = 11 : i64} {
  func.func @embed_kernel(%arg0: i32, %arg1: memref<1x24x32x4xf32, #tpu.memory_space<vmem>>, %arg2: memref<1x32x4xf32, #tpu.memory_space<vmem>>, %arg3: memref<4x32xf32, #tpu.memory_space<vmem>>, %arg4: memref<4x32xf32, #tpu.memory_space<vmem>>, %arg5: memref<1x32xf32, #tpu.memory_space<vmem>>, %arg6: memref<1x32x32xf32, #tpu.memory_space<vmem>>) attributes {dimension_semantics = [#tpu.dimension_semantics<parallel>], iteration_bounds = array<i64: 2>, scalar_prefetch = 0 : i64, scratch_operands = 0 : i64, tpu.core_type = #tpu.core_type<tc>, window_params = [{transform_indices = @transform_0, window_bounds = array<i64: 1, 24, 32, 4>}, {transform_indices = @transform_1, window_bounds = array<i64: 1, 32, 4>}, {pipeline_mode = #tpu.pipeline_mode<synchronous>, transform_indices = @transform_2, window_bounds = array<i64: 4, 32>}, {pipeline_mode = #tpu.pipeline_mode<synchronous>, transform_indices = @transform_3, window_bounds = array<i64: 4, 32>}, {pipeline_mode = #tpu.pipeline_mode<synchronous>, transform_indices = @transform_4, window_bounds = array<i64: 1, 32>}, {transform_indices = @transform_5, window_bounds = array<i64: 1, 32, 32>}]} {
    %c0 = arith.constant 0 : index
    %c0_0 = arith.constant 0 : index
    %0 = vector.load %arg3[%c0, %c0_0] : memref<4x32xf32, #tpu.memory_space<vmem>>, vector<4x32xf32>
    %cst = arith.constant 0xFF800000 : f32
    %1 = vector.broadcast %cst : f32 to vector<32x32xf32>
    %c0_i32 = arith.constant 0 : i32
    %c24_i32 = arith.constant 24 : i32
    %2 = arith.addi %c0_i32, %c24_i32 : i32
    %c1_i32 = arith.constant 1 : i32
    %3 = scf.for %arg7 = %c0_i32 to %2 step %c1_i32 iter_args(%arg8 = %1) -> (vector<32x32xf32>)  : i32 {
      %c0_13 = arith.constant 0 : index
      %15 = arith.index_cast %arg7 : i32 to index
      %c0_14 = arith.constant 0 : index
      %c0_15 = arith.constant 0 : index
      %16 = vector.load %arg1[%c0_13, %15, %c0_14, %c0_15] : memref<1x24x32x4xf32, #tpu.memory_space<vmem>>, vector<1x1x32x4xf32>
      %17 = vector.shape_cast %16 : vector<1x1x32x4xf32> to vector<32x4xf32>
      %cst_16 = arith.constant dense<0.000000e+00> : vector<32x32xf32>
      %18 = tpu.matmul %17, %0, %cst_16 {dimension_numbers = #tpu.dot_dimension_numbers<[1], [0], [0], [1], [0, 0, 1, 1], [], []>} : vector<32x4xf32>, vector<4x32xf32>, vector<32x32xf32> -> vector<32x32xf32>
      %19 = arith.maximumf %arg8, %18 : vector<32x32xf32>
      scf.yield %19 : vector<32x32xf32>
    }
    %c24_i32_1 = arith.constant 24 : i32
    %c0_2 = arith.constant 0 : index
    %c0_3 = arith.constant 0 : index
    %c0_4 = arith.constant 0 : index
    %4 = vector.load %arg2[%c0_2, %c0_3, %c0_4] : memref<1x32x4xf32, #tpu.memory_space<vmem>>, vector<1x32x4xf32>
    %5 = vector.shape_cast %4 : vector<1x32x4xf32> to vector<32x4xf32>
    %c0_5 = arith.constant 0 : index
    %c0_6 = arith.constant 0 : index
    %6 = vector.load %arg4[%c0_5, %c0_6] : memref<4x32xf32, #tpu.memory_space<vmem>>, vector<4x32xf32>
    %cst_7 = arith.constant dense<0.000000e+00> : vector<32x32xf32>
    %7 = tpu.matmul %5, %6, %cst_7 {dimension_numbers = #tpu.dot_dimension_numbers<[1], [0], [0], [1], [0, 0, 1, 1], [], []>} : vector<32x4xf32>, vector<4x32xf32>, vector<32x32xf32> -> vector<32x32xf32>
    %c0_8 = arith.constant 0 : index
    %c0_9 = arith.constant 0 : index
    %8 = vector.load %arg5[%c0_8, %c0_9] : memref<1x32xf32, #tpu.memory_space<vmem>>, vector<1x32xf32>
    %9 = vector.broadcast %8 : vector<1x32xf32> to vector<32x32xf32>
    %10 = arith.addf %7, %9 : vector<32x32xf32>
    %11 = arith.addf %3, %10 : vector<32x32xf32>
    %c0_10 = arith.constant 0 : index
    %c0_11 = arith.constant 0 : index
    %c0_12 = arith.constant 0 : index
    %12 = vector.load %arg6[%c0_10, %c0_11, %c0_12] : memref<1x32x32xf32, #tpu.memory_space<vmem>>, vector<1x32x32xf32>
    %13 = vector.shape_cast %12 : vector<1x32x32xf32> to vector<32x32xf32>
    %14 = vector.shape_cast %11 : vector<32x32xf32> to vector<1x32x32xf32>
    tpu.vector_store %arg6[%c0_10, %c0_11, %c0_12], %14 {strides = array<i32>} : memref<1x32x32xf32, #tpu.memory_space<vmem>>, vector<1x32x32xf32>,
    return
  }
  func.func @transform_0(%arg0: i32) -> (i32, i32, i32, i32) {
    %c0_i32 = arith.constant 0 : i32
    %c0_i32_0 = arith.constant 0 : i32
    %c0_i32_1 = arith.constant 0 : i32
    %c0_i32_2 = arith.constant 0 : i32
    return %arg0, %c0_i32, %c0_i32_0, %c0_i32_1 : i32, i32, i32, i32
  }
  func.func @transform_1(%arg0: i32) -> (i32, i32, i32) {
    %c0_i32 = arith.constant 0 : i32
    %c0_i32_0 = arith.constant 0 : i32
    %c0_i32_1 = arith.constant 0 : i32
    return %arg0, %c0_i32, %c0_i32_0 : i32, i32, i32
  }
  func.func @transform_2(%arg0: i32) -> (i32, i32) {
    %c0_i32 = arith.constant 0 : i32
    %c0_i32_0 = arith.constant 0 : i32
    %c0_i32_1 = arith.constant 0 : i32
    return %c0_i32, %c0_i32_0 : i32, i32
  }
  func.func @transform_3(%arg0: i32) -> (i32, i32) {
    %c0_i32 = arith.constant 0 : i32
    %c0_i32_0 = arith.constant 0 : i32
    %c0_i32_1 = arith.constant 0 : i32
    return %c0_i32, %c0_i32_0 : i32, i32
  }
  func.func @transform_4(%arg0: i32) -> (i32, i32) {
    %c0_i32 = arith.constant 0 : i32
    %c0_i32_0 = arith.constant 0 : i32
    %c0_i32_1 = arith.constant 0 : i32
    return %c0_i32, %c0_i32_0 : i32, i32
  }
  func.func @transform_5(%arg0: i32) -> (i32, i32, i32) {
    %c0_i32 = arith.constant 0 : i32
    %c0_i32_0 = arith.constant 0 : i32
    %c0_i32_1 = arith.constant 0 : i32
    return %arg0, %c0_i32, %c0_i32_0 : i32, i32, i32
  }
}

</mosaic_0001>

<bundles_post_ra>
// kernel: tpu_custom_call.1
= control target key start
LH: loop header
LB: loop body
LE: loop exit
PB: predicated region body
PF: predicated region fallthrough
CT: control target
= control target key end

     0   :  { %10 = vsyncpa [#allocation3], 0  ;;  %s880_s0 = inlined_call_operand.vmem [shape: f32[2,24,32,4], index: 0, kind: input, shape index: {}]   ;;  %s881_s1 = inlined_call_operand.vmem [shape: f32[2,32,4], index: 1, kind: input, shape index: {}]   ;;  %s882_s2 = inlined_call_operand.vmem [shape: f32[4,32], index: 2, kind: input, shape index: {}]   ;;  %s883_s3 = inlined_call_operand.vmem [shape: f32[4,32], index: 3, kind: input, shape index: {}]   ;;  %s884_s4 = inlined_call_operand.vmem [shape: f32[1,32], index: 4, kind: input, shape index: {}]   ;;  %s885_s5 = inlined_call_operand.hbm [shape: f32[2,32,32], index: 5, kind: output, shape index: {}]  }
   0x1   :  { %12 = vsyncpa [#allocation3 + $0x1], 0  ;;  %s734_s18 = smov 0   ;;  %s736_s19 = smov 0  }
   0x2   :  { %s738_s20 = smov 0   ;;  %s740_s21 = smov 0  }
   0x3 LB: > { %s755_s22 = sadd.s32 4294967295, %s680_s21   ;;  %s483_s23 = sadd.s32 4294967294, %s680_s21   ;;  %s680_s21 = sphi %s740_s21, %s891_s21   ;;  %s676_s20 = sphi %s738_s20, %s890_s20   ;;  %s672_s19 = sphi %s736_s19, %s889_s19   ;;  %s668_s18 = sphi %s734_s18, %s888_s18  }
   0x4   : > { %s759_s24 = sadd.s32 1, %s680_s21   ;;  %s140_s25 = sadd.s32 1, %s676_s20 }
   0x5   : > { %s137_s26 = ssub.s32 %s680_s21, %s759_s24  ;;  %p150_p0 = scmp.ne.s32.totalorder %s676_s20, %s672_s19 }
   0x6   : > { %p138_p1 = scmp.eq.s32.totalorder %s137_s26, 0  ;;  %p151_p2 = scmp.eq.s32.totalorder %s755_s22, 1 }
   0x7   : > { %p156_p3 = scmp.ne.s32.totalorder %s672_s19, %s668_s18  ;;  %p157_p4 = scmp.eq.s32.totalorder %s483_s23, 1 }
   0x8   : > { %s770_s27 = scalar_select %p138_p1, %s676_s20, %s140_s25  }
   0x9   : > { %p772_p5 = por %p151_p2, %p150_p0  ;;  %p776_p6 = por %p157_p4, %p156_p3 }
   0xa   : > { %p486_p7 = scmp.ge.s32.totalorder %s680_s21, 1  ;;  %p200_p8 = scmp.lt.s32.totalorder %s680_s21, 3 }
   0xc   : > { %p201_p9 = pnand %p486_p7, %p200_p8 }
   0xd   : > { %s230_s30 = sand.u32 (!%p201_p9), 1, %s672_s19   ;;  %p233_p10 = scmp.lt.s32.totalorder (!%p201_p9), %s755_s22, 1 }
   0xe   : > { %204 = sbr.rel (%p201_p9) target bundleno = 176 (0xb0), region = 40  ;;  %s487_s8 = sshll.u32 (!%p201_p9), %s230_s30, 5 }
   0xf   : > { %s800_s23 = scalar_lea.vmem (!%p201_p9), [#allocation2], %s487_s8  ;;  %s802_s25 = smov (!%p201_p9), 0  }
  0x13   : > { %v243_v0 = vld [vmem:[%s882_s2] sm:$0xf]  ;;  %s234_s9 = scalar_select %p233_p10, %s755_s22, 1  ;;  %v682_v1 = vmov -inf   ;;  %v686_v2 = vmov -inf   ;;  %v690_v3 = vmov -inf  }
  0x14   : > { %v694_v4 = vmov -inf  }
  0x15   : > { %s515_s10 = smul.u32 768, %s234_s9  ;;  %s507_s11 = sshll.u32 %s234_s9, 5 }
  0x16   : > { %s793_s14 = scalar_lea.vmem %s881_s1, %s507_s11 }
  0x17   : > { %s798_s17 = scalar_lea.vmem %s880_s0, %s515_s10 }
  0x18 LB: >> { %vm273_vm0 = vcmask 1043456   ;;  %s491_s26 = sshll.u32 %s700_s25, 5  ;;  %vm260_vm1 = vcmask 31744   ;;  %s249_s25 = sadd.s32 1, %s700_s25   ;;  %s700_s25 = sphi %s802_s25, %s249_s25   ;;  %v696_v4 = vphi %v694_v4, %v695_v4   ;;  %v692_v3 = vphi %v690_v3, %v691_v3   ;;  %v688_v2 = vphi %v686_v2, %v687_v2   ;;  %v684_v1 = vphi %v682_v1, %v683_v1  }
  0x19   : >> { %510 = vmatpush.msk.msra.mxu2 %vm273_vm0, %v243_v0  ;;  %511 = vmatpush.msk.msra.mxu3 %vm273_vm0, %v243_v0  ;;  %s255_s6 = scalar_lea.vmem %s798_s17, %s491_s26  ;;  %p246_p11 = scmp.ge.s32.totalorder %s249_s25, 24  }
  0x1a   : >> { %492 = vmatpush.msk.msra.mxu0 %vm273_vm0, %v243_v0  ;;  %509 = vmatpush.msk.msra.mxu1 %vm273_vm0, %v243_v0  ;;  %v258_v5 = vld [vmem:[%s255_s6 + $0x10] sm:$0xff]  ;;  %v259_v6 = vld [vmem:[%s255_s6 + $0x18] sm:$0xff]  ;;  %v256_v7 = vld [vmem:[%s255_s6] sm:$0xff]  ;;  %s508_s11 = sshll.u32 (%p246_p11), %s755_s22, 5  ;;  %vm369_vm2 = vcmask (%p246_p11), 261120   ;;  %s387_s15 = sshll.u32 (%p246_p11), %s800_s23, 4  ;;  %s388_s15 = int_to_ptr.vmem [resolvable:$true] %s387_s15 }
  0x1b   : >> { %495 = vmatmul.msk.f32.vlgmr.msra.gmra.mxu2 %vm260_vm1, %v258_v5  ;;  %496 = vmatmul.msk.f32.vlgmr.msra.gmra.mxu3 %vm260_vm1, %v259_v6  ;;  %v257_v8 = vld [vmem:[%s255_s6 + $0x8] sm:$0xff]  ;;  %v314_v17 = vld [vmem:[%s883_s3] sm:$0xf] (%p246_p11)  ;;  %v312_v18 = vld [vmem:[%s793_s14 + $0x10] sm:$0xff] (%p246_p11)  ;;  %s375_s22 = scalar_lea.sflag (%p246_p11), [#allocation3], %s230_s30  ;;  %s618_s7 = scalar_lea.hbm (%p246_p11), %s885_s5, 64 }
  0x1c   : >> { %493 = vmatmul.msk.f32.vlgmr.msra.gmra.mxu0 %vm260_vm1, %v256_v7  ;;  %494 = vmatmul.msk.f32.vlgmr.msra.gmra.mxu1 %vm260_vm1, %v257_v8  ;;  %v313_v19 = vld [vmem:[%s793_s14 + $0x18] sm:$0xff] (%p246_p11)  ;;  %v310_v20 = vld [vmem:[%s793_s14] sm:$0xff] (%p246_p11)  ;;  %v311_v21 = vld [vmem:[%s793_s14 + $0x8] sm:$0xff] (%p246_p11)  ;;  %s386_s14 = scalar_lea.hbm (%p246_p11), %s885_s5, %s508_s11 }
  0x1d   : > { %513 = vmatpush.msk.msra.mxu2 (%p246_p11), %vm273_vm0, %v314_v17  ;;  %514 = vmatpush.msk.msra.mxu3 (%p246_p11), %vm273_vm0, %v314_v17  ;;  %v597_v22 = vld [vmem:[%s884_s4] ss:$0 sm:$0xff] (%p246_p11)  ;;  %s389_s16 = sshll.u32 (%p246_p11), %s386_s14, 4  ;;  %s390_s16 = int_to_ptr.hbm [resolvable:$true] %s389_s16 }
  0x1e   : > { %497 = vmatpush.msk.msra.mxu0 (%p246_p11), %vm273_vm0, %v314_v17  ;;  %512 = vmatpush.msk.msra.mxu1 (%p246_p11), %vm273_vm0, %v314_v17  ;;  %s612_s17 = sshra.s32 (%p246_p11), %s390_s16, 4  ;;  %s613_s17 = int_to_ptr.hbm [resolvable:$true] %s612_s17 }
  0x1f   : > { %s614_s25 = scalar_lea.hbm (%p246_p11), %s613_s17, 32  ;;  %p619_p1 = scmp.lt.s32.totalorder (%p246_p11), %s613_s17, %s885_s5 }
  0x20   : > { %p615_p12 = scmp.ne.s32.totalorder (%p246_p11), %s613_s17, %s614_s25  ;;  %p620_p2 = scmp.lt.s32.totalorder (%p246_p11), %s618_s7, %s614_s25 }
  0x22   : > { %p616_p13 = pnand (%p246_p11), %p615_p12, %p772_p5  ;;  %p621_p3 = por (%p246_p11), %p620_p2, %p619_p1 }
  0x23   : > { %500 = vmatmul.msk.f32.vlgmr.msra.gmra.mxu2 (%p246_p11), %vm260_vm1, %v312_v18  ;;  %501 = vmatmul.msk.f32.vlgmr.msra.gmra.mxu3 (%p246_p11), %vm260_vm1, %v313_v19 }
  0x24   : > { %498 = vmatmul.msk.f32.vlgmr.msra.gmra.mxu0 (%p246_p11), %vm260_vm1, %v310_v20  ;;  %499 = vmatmul.msk.f32.vlgmr.msra.gmra.mxu1 (%p246_p11), %vm260_vm1, %v311_v21  ;;  %p617_p0 = pneg (%p246_p11), %p616_p13 }
  0x26   : > { %p622_p4 = pnand (%p246_p11), %p621_p3, %p617_p0 }
  0x99   : >> { %v294_v9 = vpop.f32.mrf.mxu0  ;;  %v297_v10 = vpop.f32.mrf.mxu1 }
  0x9a   : >> { %v306_v11 = vmax.f32 %v696_v4, %v294_v9   ;;  %v307_v12 = vmax.f32 %v692_v3, %v297_v10  }
  0x9c   : >> { %v691_v3 = vmov %v307_v12   ;;  %v695_v4 = vmov %v306_v11  }
  0x9d   : > { %248 = sbr.rel (!%p246_p11) target bundleno = 24 (0x18), region = 86 }
  0x9e   : >> { %v300_v13 = vpop.f32.mrf.mxu2  ;;  %v303_v14 = vpop.f32.mrf.mxu3 }
  0x9f   : >> { %v308_v15 = vmax.f32 %v688_v2, %v300_v13   ;;  %v309_v16 = vmax.f32 %v684_v1, %v303_v14  }
  0xa1   : >> { %v683_v1 = vmov %v309_v16   ;;  %v687_v2 = vmov %v308_v15   ;;  %v353_v23 = vpop.f32.mrf.mxu0 (%p246_p11)  ;;  %v356_v24 = vpop.f32.mrf.mxu1 (%p246_p11) }
  0xa2   : > { %v354_v25 = vadd.f32 %v597_v22, %v353_v23  ;;  %v357_v26 = vadd.f32 %v597_v22, %v356_v24 }
  0xa4   : > { %v365_v27 = vadd.f32 %v354_v25, %v306_v11  ;;  %v366_v28 = vadd.f32 %v357_v26, %v307_v12 }
  0xa6   : > { %v359_v29 = vpop.f32.mrf.mxu2  ;;  %v362_v30 = vpop.f32.mrf.mxu3  ;;  %370 = vst.msk [vmem:[%s800_s23] sm:$0xff] %vm369_vm2, %v365_v27 }
  0xa7   : > { %v360_v31 = vadd.f32 %v597_v22, %v359_v29  ;;  %v363_v32 = vadd.f32 %v597_v22, %v362_v30  ;;  %371 = vst.msk [vmem:[%s800_s23 + $0x8] sm:$0xff] %vm369_vm2, %v366_v28 }
  0xa9   : > { %v367_v33 = vadd.f32 %v360_v31, %v308_v15  ;;  %v368_v34 = vadd.f32 %v363_v32, %v309_v16 }
  0xab   : > { %372 = vst.msk [vmem:[%s800_s23 + $0x10] sm:$0xff] %vm369_vm2, %v367_v33 }
  0xac   : > { %373 = vst.msk [vmem:[%s800_s23 + $0x18] sm:$0xff] %vm369_vm2, %v368_v34 }
  0xad   : > { %625 = shalt.err (!%p622_p4)
}
  0xae   : > { %s702_s30 = smov 128   ;;  %s703_s23 = smov 8  }
  0xaf   : > { %516 = dma.vmem_to_hbm [thread:$0]  (%p772_p5), %s388_s15, 512, %s390_s16, %s375_s22, %s702_s30, %s702_s30, %s703_s23  }
  0xb0 PF: > { %p522_p7 = scmp.ge.s32.totalorder %s680_s21, 2  ;;  %s404_s10 = sand.u32 1, %s668_s18  }
  0xb1   : > { %s405_s11 = scalar_lea.sflag [#allocation3], %s404_s10 }
  0xb2   : > { %p519_p8 = pnand %p522_p7, %p776_p6 }
  0xb4   : > { %p520_p9 = pneg %p519_p8 }
  0xb6   : > { %663 = dma.done.wait (%p520_p9), %s405_s11, 512  }
  0xb7   : > { %665 = vsyncadd (%p520_p9), %s405_s11, 4294966784  ;;  %p15_p10 = scmp.ge.s32.totalorder %s759_s24, 4   ;;  %s888_s18 = smov %s672_s19 }
  0xb8   : > { %s889_s19 = smov %s676_s20  ;;  %s890_s20 = smov %s770_s27 }
  0xb9   : > { %s891_s21 = smov %s759_s24  ;;  %17 = sbr.rel (!%p15_p10) target bundleno = 3 (0x3), region = 97 }
  0xbe   :  { %411 = vsyncpa [#allocation3], 1 }
  0xbf   :  { %413 = vsyncpa [#allocation3 + $0x1], 1 }

</bundles_post_ra>
